<compile_context>
chip_gen: v7x
topology: tpu7x:2x2x1
jax: 0.10.0
libtpu: 0.0.40
codegen_flags: <defaults>
</compile_context>

<pallas_src>
import jax
import jax.numpy as jnp
from jax import lax
from jax.experimental import pallas as pl
from jax.experimental.pallas import tpu as pltpu

_LANE = 128
_SUBLANE = 8
_ROWS_PER_ITER = 64                    # rows folded per fori_loop step (multiple of 8)
_TARGET_BLOCK_BYTES = 4 * 1024 * 1024  # ~4 MiB of input per operand per grid step
_VMEM_LIMIT_BYTES = 48 * 1024 * 1024   # explicit scoped-VMEM budget (< v7x 64 MiB phys)


def _round_up(x: int, m: int) -> int:
    return (x + m - 1) // m * m


def _choose_tiling(rows: int, itemsize: int):
    """Pick (tile_rows, rows_per_iter): ~4 MiB/input per step, >=2 blocks if possible."""
    rows_per_iter = min(_ROWS_PER_ITER, _round_up(rows, _SUBLANE))
    target = max(rows_per_iter, _TARGET_BLOCK_BYTES // (_LANE * itemsize))
    target = _round_up(target, rows_per_iter)
    tile = min(target, _round_up(rows, rows_per_iter))
    # Keep >=2 grid blocks when there is enough work so both v7x TensorCores
    # get a share (no effect on single-TC v5e/v6e).
    if pl.cdiv(rows, tile) == 1 and rows > rows_per_iter:
        tile = max(rows_per_iter, _round_up(pl.cdiv(rows, 2), rows_per_iter))
    return tile, rows_per_iter


def _make_partial_kernel(tile_rows: int, rows_per_iter: int, rows_valid: int,
                         need_mask: bool):
    n_iters = tile_rows // rows_per_iter
    groups = rows_per_iter // _SUBLANE

    def kernel(x_ref, t_ref, o_ref):
        base_row = pl.program_id(0) * tile_rows
        if need_mask:
            # Hoisted once per grid step; per-chunk offset added as a scalar.
            sub_iota = lax.broadcasted_iota(jnp.int32, (rows_per_iter, _LANE), 0)

        def body(it, acc):
            r0 = pl.multiple_of(it * rows_per_iter, rows_per_iter)
            x = x_ref[pl.ds(r0, rows_per_iter), :].astype(jnp.float32)
            t = t_ref[pl.ds(r0, rows_per_iter), :].astype(jnp.float32)
            d = x - t
            sq = d * d
            if need_mask:
                row_ids = sub_iota + (base_row + it * rows_per_iter)
                sq = jnp.where(row_ids < rows_valid, sq, 0.0)  # drop garbage overhang
            if groups > 1:
                # Fold the chunk into an (8, 128) partial with pure VPU adds.
                sq = jnp.sum(sq.reshape(groups, _SUBLANE, _LANE), axis=0)
            return acc + sq

        acc = lax.fori_loop(0, n_iters, body,
                            jnp.zeros((_SUBLANE, _LANE), jnp.float32),
                            unroll=min(8, n_iters))
        o_ref[...] = acc

    return kernel


def custom_loss_pallas(x, target, hyperparam):
    """Computes mean(hyperparam * (x - target)**2) with a Pallas TPU kernel."""
    assert x.shape == target.shape, "input/target shapes must match"
    total = x.size
    assert total > 0, "empty input"

    # Flatten; inputs stream in their original dtype (upcast happens in-kernel).
    xf = x.reshape(-1)
    tf = target.reshape(-1)

    rem = total % _LANE
    if rem:
        # Ragged tail: pad by <128 elements so the lane-dense [rows, 128] view
        # exists.  Zero-padded lanes give (0-0)^2 = 0, no lane mask needed.
        # TODO(synk): for huge non-128-aligned inputs this is still one extra
        # copy pass; a manual-DMA 1-D path could avoid it.
        pad = _LANE - rem
        xf = jnp.pad(xf, (0, pad))
        tf = jnp.pad(tf, (0, pad))

    rows = xf.size // _LANE
    x2 = xf.reshape(rows, _LANE)
    t2 = tf.reshape(rows, _LANE)

    tile_rows, rows_per_iter = _choose_tiling(rows, x.dtype.itemsize)
    num_blocks = pl.cdiv(rows, tile_rows)
    need_mask = (rows % tile_rows) != 0  # last block overhangs -> in-kernel row mask

    bytes_accessed = (x2.size * x2.dtype.itemsize
                      + t2.size * t2.dtype.itemsize
                      + num_blocks * _SUBLANE * _LANE * 4)

    partials = pl.pallas_call(
        _make_partial_kernel(tile_rows, rows_per_iter, rows, need_mask),
        out_shape=jax.ShapeDtypeStruct((num_blocks * _SUBLANE, _LANE), jnp.float32),
        grid_spec=pltpu.PrefetchScalarGridSpec(
            num_scalar_prefetch=0,
            grid=(num_blocks,),
            in_specs=[
                pl.BlockSpec((tile_rows, _LANE), lambda i: (i, 0)),
                pl.BlockSpec((tile_rows, _LANE), lambda i: (i, 0)),
            ],
            out_specs=pl.BlockSpec((_SUBLANE, _LANE), lambda i: (i, 0)),
        ),
        compiler_params=pltpu.CompilerParams(
            # Independent partial sums: shard the grid across TensorCores on
            # multi-TC chips (v7x); harmless on v5e/v6e.
            dimension_semantics=("parallel",),
            vmem_limit_bytes=_VMEM_LIMIT_BYTES,
        ),
        cost_estimate=pl.CostEstimate(
            flops=3 * total, transcendentals=0, bytes_accessed=bytes_accessed),
    )(x2, t2)

    # Tiny final reduction + hyperparam/N scaling outside the kernel.
    scale = jnp.asarray(hyperparam, dtype=jnp.float32) / jnp.float32(total)
    return jnp.sum(partials) * scale


if __name__ == "__main__":
    key = jax.random.PRNGKey(0)
    k1, k2, k3, k4, k5, k6 = jax.random.split(key, 6)
    hyperparam = 0.5

    # Regression-style batch (batch=32, features=128): 128-aligned, zero-copy path.
    x = jax.random.normal(k1, (32, 128), dtype=jnp.float32)
    t = jax.random.normal(k2, (32, 128), dtype=jnp.float32)
    loss = custom_loss_pallas(x, t, hyperparam)
    jax.block_until_ready(loss)
    ref = jnp.mean(hyperparam * (x - t) ** 2)
    assert jnp.allclose(loss, ref, rtol=1e-5, atol=1e-6), (loss, ref)

    # Ragged shape: small (<128 elem) pad + in-kernel masked overhang rows.
    xr = jax.random.normal(k3, (7, 50), dtype=jnp.float32)
    tr = jax.random.normal(k4, (7, 50), dtype=jnp.float32)
    loss_r = custom_loss_pallas(xr, tr, hyperparam)
    jax.block_until_ready(loss_r)
    ref_r = jnp.mean(hyperparam * (xr - tr) ** 2)
    assert jnp.allclose(loss_r, ref_r, rtol=1e-5, atol=1e-6), (loss_r, ref_r)

    # Multi-block case (>=2 grid blocks for v7x megacore) with masked last block.
    xm = jax.random.normal(k5, (257, 130), dtype=jnp.float32)
    tm = jax.random.normal(k6, (257, 130), dtype=jnp.float32)
    loss_m = custom_loss_pallas(xm, tm, hyperparam)
    jax.block_until_ready(loss_m)
    ref_m = jnp.mean(hyperparam * (xm - tm) ** 2)
    assert jnp.allclose(loss_m, ref_m, rtol=1e-5, atol=1e-6), (loss_m, ref_m)

    print("KERNEL_OK")
</pallas_src>

<mosaic_0001>
module attributes {stable_mosaic.version = 11 : i64} {
  func.func @kernel(%arg0: i32, %arg1: memref<32x128xf32, #tpu.memory_space<vmem>>, %arg2: memref<32x128xf32, #tpu.memory_space<vmem>>, %arg3: memref<8x128xf32, #tpu.memory_space<vmem>>) attributes {dimension_semantics = [#tpu.dimension_semantics<parallel>], iteration_bounds = array<i64: 1>, scalar_prefetch = 0 : i64, scratch_operands = 0 : i64, tpu.core_type = #tpu.core_type<tc>, window_params = [{transform_indices = @transform_0, window_bounds = array<i64: 32, 128>}, {transform_indices = @transform_1, window_bounds = array<i64: 32, 128>}, {transform_indices = @transform_2, window_bounds = array<i64: 8, 128>}]} {
    %cst = arith.constant 0.000000e+00 : f32
    %0 = vector.broadcast %cst : f32 to vector<8x128xf32>
    %c0_i32 = arith.constant 0 : i32
    %c32_i32 = arith.constant 32 : i32
    %1 = arith.muli %c0_i32, %c32_i32 : i32
    %2 = tpu.assume_multiple %1, 32 : i32
    %3 = arith.index_cast %2 : i32 to index
    %c0 = arith.constant 0 : index
    %4 = vector.load %arg1[%3, %c0] : memref<32x128xf32, #tpu.memory_space<vmem>>, vector<32x128xf32>
    %5 = arith.index_cast %2 : i32 to index
    %c0_0 = arith.constant 0 : index
    %6 = vector.load %arg2[%5, %c0_0] : memref<32x128xf32, #tpu.memory_space<vmem>>, vector<32x128xf32>
    %7 = arith.subf %4, %6 : vector<32x128xf32>
    %8 = arith.mulf %7, %7 : vector<32x128xf32>
    %9 = vector.shape_cast %8 : vector<32x128xf32> to vector<4x8x128xf32>
    %cst_1 = arith.constant dense<0.000000e+00> : vector<8x128xf32>
    %10 = vector.multi_reduction <add>, %9, %cst_1 [0] : vector<4x8x128xf32> to vector<8x128xf32>
    %11 = arith.addf %0, %10 : vector<8x128xf32>
    %c1_i32 = arith.constant 1 : i32
    %c0_2 = arith.constant 0 : index
    %c0_3 = arith.constant 0 : index
    %12 = vector.load %arg3[%c0_2, %c0_3] : memref<8x128xf32, #tpu.memory_space<vmem>>, vector<8x128xf32>
    tpu.vector_store %arg3[%c0_2, %c0_3], %11 {strides = array<i32>} : memref<8x128xf32, #tpu.memory_space<vmem>>, vector<8x128xf32>,
    return
  }
  func.func @transform_0(%arg0: i32) -> (i32, i32) {
    %c0_i32 = arith.constant 0 : i32
    %c0_i32_0 = arith.constant 0 : i32
    return %arg0, %c0_i32 : i32, i32
  }
  func.func @transform_1(%arg0: i32) -> (i32, i32) {
    %c0_i32 = arith.constant 0 : i32
    %c0_i32_0 = arith.constant 0 : i32
    return %arg0, %c0_i32 : i32, i32
  }
  func.func @transform_2(%arg0: i32) -> (i32, i32) {
    %c0_i32 = arith.constant 0 : i32
    %c0_i32_0 = arith.constant 0 : i32
    return %arg0, %c0_i32 : i32, i32
  }
}

</mosaic_0001>

<bundles_post_ra>
// kernel: tpu_custom_call.1
= control target key start
LH: loop header
LB: loop body
LE: loop exit
PB: predicated region body
PF: predicated region fallthrough
CT: control target
= control target key end

     0   :  { %7 = vsyncpa [#allocation3], 0  ;;  %s210_s0 = inlined_call_operand.hbm [shape: f32[32,128], index: 0, kind: input, shape index: {}]   ;;  %s211_s1 = inlined_call_operand.hbm [shape: f32[32,128], index: 1, kind: input, shape index: {}]   ;;  %s212_s2 = inlined_call_operand.hbm [shape: f32[8,128], index: 2, kind: output, shape index: {}]  }
   0x1   :  { %8 = vsyncpa [#allocation6], 0 }
   0x2   :  { %9 = vsyncpa [#allocation4], 0  ;;  %s154_s9 = smov [#allocation2]   ;;  %s82_s13 = scalar_lea.hbm %s210_s0, 512 }
   0x3   :  { %s15_s10 = sshll.u32 %s154_s9, 4  ;;  %p83_p0 = scmp.ne.s32.totalorder %s210_s0, %s82_s13  ;;  %s16_s10 = int_to_ptr.vmem [resolvable:$true] %s15_s10 }
   0x4   :  { %p86_p1 = scmp.lt.u32.totalorder %s82_s13, %s210_s0 }
   0x6   :  { %p88_p2 = pnand %p86_p1, %p83_p0 }
   0x8   :  { %91 = shalt.err (!%p88_p2)
}
   0x9   :  { %s92_s18 = scalar_lea.vmem %s16_s10, 512  ;;  %p97_p4 = scmp.lt.s32.totalorder %s16_s10, %s16_s10 }
   0xa   :  { %p93_p3 = scmp.ne.s32.totalorder %s16_s10, %s92_s18  ;;  %p98_p5 = scmp.lt.s32.totalorder %s92_s18, %s92_s18 }
   0xc   :  { %p99_p6 = por %p98_p5, %p97_p4 }
   0xe   :  { %p100_p7 = pnand %p99_p6, %p93_p3 }
  0x10   :  { %103 = shalt.err (!%p100_p7)
}
  0x11   :  { %s155_s19 = smov 128   ;;  %s156_s20 = smov 8  }
  0x12   :  { %21 = dma.hbm_to_vmem [thread:$0]  %s210_s0, 512, %s16_s10, [#allocation3], %s155_s19, %s155_s19, %s156_s20  }
  0x13   :  { %s157_s23 = smov [#allocation5]   ;;  %s104_s27 = scalar_lea.hbm %s211_s1, 512 }
  0x14   :  { %s27_s24 = sshll.u32 %s157_s23, 4  ;;  %p105_p8 = scmp.ne.s32.totalorder %s211_s1, %s104_s27  ;;  %s28_s24 = int_to_ptr.vmem [resolvable:$true] %s27_s24 }
  0x15   :  { %p108_p9 = scmp.lt.u32.totalorder %s104_s27, %s211_s1 }
  0x17   :  { %p110_p10 = pnand %p108_p9, %p105_p8 }
  0x19   :  { %113 = shalt.err (!%p110_p10)
}
  0x1a   :  { %s114_s4 = scalar_lea.vmem %s28_s24, 512  ;;  %p119_p12 = scmp.lt.s32.totalorder %s28_s24, %s28_s24 }
  0x1b   :  { %p115_p11 = scmp.ne.s32.totalorder %s28_s24, %s114_s4  ;;  %p120_p13 = scmp.lt.s32.totalorder %s114_s4, %s114_s4 }
  0x1d   :  { %p121_p0 = por %p120_p13, %p119_p12 }
  0x1f   :  { %p122_p1 = pnand %p121_p0, %p115_p11 }
  0x21   :  { %125 = shalt.err (!%p122_p1)
}
  0x22   :  { %33 = dma.hbm_to_vmem [thread:$0]  %s211_s1, 512, %s28_s24, [#allocation6], %s155_s19, %s155_s19, %s156_s20  }
  0x23   :  { %148 = dma.done.wait [#allocation3], 512  }
  0x24   :  { %149 = vsyncadd [#allocation3], 4294966784 }
  0x25   :  { %150 = dma.done.wait [#allocation6], 512  }
  0x26   :  { %151 = vsyncadd [#allocation6], 4294966784  ;;  %v40_v0 = vld [vmem:[#allocation2] sm:$0xff]  ;;  %v41_v1 = vld [vmem:[#allocation2 + $0x8] sm:$0xff]  ;;  %s158_s1 = smov [#allocation7]  }
  0x27   :  { %v42_v2 = vld [vmem:[#allocation2 + $0x10] sm:$0xff]  ;;  %v43_v3 = vld [vmem:[#allocation2 + $0x18] sm:$0xff]  ;;  %v44_v4 = vld [vmem:[#allocation5] sm:$0xff]  ;;  %s67_s6 = sshll.u32 %s158_s1, 4  ;;  %s68_s6 = int_to_ptr.vmem [resolvable:$true] %s67_s6 }
  0x28   :  { %v45_v5 = vld [vmem:[#allocation5 + $0x8] sm:$0xff]  ;;  %v46_v6 = vld [vmem:[#allocation5 + $0x10] sm:$0xff]  ;;  %v47_v7 = vld [vmem:[#allocation5 + $0x18] sm:$0xff]  ;;  %v48_v8 = vsub.f32 %v40_v0, %v44_v4  ;;  %s126_s7 = scalar_lea.vmem %s68_s6, 128  ;;  %p131_p3 = scmp.lt.s32.totalorder %s68_s6, %s68_s6 }
  0x29   :  { %v49_v9 = vsub.f32 %v41_v1, %v45_v5  ;;  %v50_v10 = vsub.f32 %v42_v2, %v46_v6  ;;  %v51_v11 = vsub.f32 %v43_v3, %v47_v7  ;;  %p127_p2 = scmp.ne.s32.totalorder %s68_s6, %s126_s7  ;;  %p132_p4 = scmp.lt.s32.totalorder %s126_s7, %s126_s7 }
  0x2a   :  { %v52_v12 = vmul.f32 %v48_v8, %v48_v8 }
  0x2b   :  { %v53_v13 = vmul.f32 %v49_v9, %v49_v9  ;;  %v54_v14 = vmul.f32 %v50_v10, %v50_v10  ;;  %v55_v15 = vmul.f32 %v51_v11, %v51_v11  ;;  %p133_p5 = por %p132_p4, %p131_p3 }
  0x2d   :  { %v56_v16 = vadd.f32 %v53_v13, %v52_v12  ;;  %p134_p6 = pnand %p133_p5, %p127_p2 }
  0x2f   :  { %v57_v17 = vadd.f32 %v56_v16, %v54_v14 }
  0x31   :  { %v58_v18 = vadd.f32 %v57_v17, %v55_v15 }
  0x33   :  { %60 = vst [vmem:[#allocation7] sm:$0xff] %v58_v18 }
  0x34   :  { %137 = shalt.err (!%p134_p6)
}
  0x35   :  { %s138_s10 = scalar_lea.hbm %s212_s2, 128 }
  0x36   :  { %p139_p7 = scmp.ne.s32.totalorder %s212_s2, %s138_s10  ;;  %p142_p8 = scmp.lt.u32.totalorder %s138_s10, %s212_s2 }
  0x38   :  { %p144_p9 = pnand %p142_p8, %p139_p7 }
  0x3a   :  { %147 = shalt.err (!%p144_p9)
}
  0x3b   :  { %70 = dma.vmem_to_hbm [thread:$0]  %s68_s6, 128, %s212_s2, [#allocation4]  }
  0x3c   :  { %152 = dma.done.wait [#allocation4], 128  }
  0x3d   :  { %153 = vsyncadd [#allocation4], 4294967168 }
  0x3e   :  { %74 = vsyncpa [#allocation3], 1 }
  0x3f   :  { %75 = vsyncpa [#allocation6], 1 }
  0x40   :  { %76 = vsyncpa [#allocation4], 1 }

</bundles_post_ra>
